<compile_context>
chip_gen: v5e
topology: v5e:2x2
jax: 0.10.0
libtpu: 0.0.40
codegen_flags: <defaults>
</compile_context>

<pallas_src>
from functools import partial

import jax
import jax.numpy as jnp
from jax.experimental import pallas as pl
from jax.experimental.pallas import tpu as pltpu


def _round_up(x, m):
    return (x + m - 1) // m * m


def _kd_loss_kernel(s_ref, t_ref, o_ref, *, inv_temp, valid_rows, block_rows):
    """One (TB, D) tile -> scalar partial sum of p_t * (log p_t - log p_s)."""
    s = s_ref[...].astype(jnp.float32)
    t = t_ref[...].astype(jnp.float32)

    eps2 = jnp.float32(1e-24)            # (1e-12)^2 : F.normalize eps, squared
    inv_t = jnp.float32(inv_temp)

    # F.normalize(p=2, dim=1) fused with the /temperature:
    #   x / max(||x||, eps) / T == x * (rsqrt(max(||x||^2, eps^2)) * (1/T))
    s_scale = jax.lax.rsqrt(
        jnp.maximum(jnp.sum(s * s, axis=1, keepdims=True), eps2)) * inv_t
    t_scale = jax.lax.rsqrt(
        jnp.maximum(jnp.sum(t * t, axis=1, keepdims=True), eps2)) * inv_t
    s_logits = s * s_scale
    t_logits = t * t_scale

    # Stable softmax pieces (XLU row max + single exp pass per operand).
    s_max = jnp.max(s_logits, axis=1, keepdims=True)
    t_max = jnp.max(t_logits, axis=1, keepdims=True)
    e_s = jnp.exp(s_logits - s_max)
    e_t = jnp.exp(t_logits - t_max)
    z_s = jnp.sum(e_s, axis=1, keepdims=True)
    z_t = jnp.sum(e_t, axis=1, keepdims=True)

    # t_lse - s_lse collapsed into a single log per row.
    delta_lse = jnp.log(z_t / z_s) + (t_max - s_max)

    # sum_j p_t * (log p_t - log p_s)
    #   = (1/z_t) * sum_j e_t * (t_logits - s_logits) - delta_lse
    num = jnp.sum(e_t * (t_logits - s_logits), axis=1, keepdims=True)
    row_kl = num / z_t - delta_lse                      # (TB, 1)

    # Mask rows past the true batch size (zero-padded last block): mask the
    # narrow per-row sums, not the full tile.
    row0 = pl.program_id(0) * block_rows
    rows = row0 + jax.lax.broadcasted_iota(jnp.int32, (block_rows, 1), 0)
    row_kl = jnp.where(rows < valid_rows, row_kl, 0.0)

    partial_sum = jnp.sum(row_kl)
    # Lane-dense (1, 8, 128) block store; wrapper reads [:, 0, 0].
    o_ref[...] = jnp.full(o_ref.shape, partial_sum, dtype=jnp.float32)


def kd_loss(student_descriptors, teacher_descriptors, temperature=1.0,
            miner_outputs=None, block_rows=512):
    """Pallas TPU implementation of KDLoss.forward.

    miner_outputs is accepted for API parity but unused (the reference forward
    ignores it). Inputs may be f32 or bf16; math is done in f32.
    """
    del miner_outputs
    B, D = student_descriptors.shape
    itemsize = jnp.dtype(student_descriptors.dtype).itemsize

    # Batch tile: multiple of 8 sublanes, capped at `block_rows` and at a VMEM
    # budget (each f32 tile temporary <= ~4 MiB, leaving room for the
    # double-buffered input pipeline + compiler temporaries on 64 MiB parts).
    tb_vmem_cap = max(8, ((4 * 2**20) // (max(D, 1) * 4)) // 8 * 8)
    tb = _round_up(min(block_rows, B, tb_vmem_cap), 8)
    b_pad = _round_up(B, tb)
    num_blocks = b_pad // tb

    if b_pad != B:
        pad = b_pad - B
        # Zero rows are numerically inert (their per-row KL is exactly 0) and
        # are additionally masked inside the kernel.
        student_descriptors = jnp.pad(student_descriptors, ((0, pad), (0, 0)))
        teacher_descriptors = jnp.pad(teacher_descriptors, ((0, pad), (0, 0)))

    kernel = partial(_kd_loss_kernel,
                     inv_temp=1.0 / float(temperature),
                     valid_rows=B,
                     block_rows=tb)

    cost = pl.CostEstimate(
        flops=int(14 * b_pad * D),
        transcendentals=int(2 * b_pad * D + 3 * b_pad),
        bytes_accessed=int(2 * b_pad * D * itemsize + num_blocks * 8 * 128 * 4),
    )

    # 2 operands x 2 pipeline buffers per tile, plus headroom for f32 temps.
    vmem_limit = int(min(100 * 2**20,
                         max(16 * 2**20,
                             4 * tb * D * itemsize + 6 * tb * D * 4)))

    out = pl.pallas_call(
        kernel,
        out_shape=jax.ShapeDtypeStruct((num_blocks, 8, 128), jnp.float32),
        grid_spec=pltpu.PrefetchScalarGridSpec(
            num_scalar_prefetch=0,
            grid=(num_blocks,),
            in_specs=[
                pl.BlockSpec((tb, D), lambda i: (i, 0)),   # student tile
                pl.BlockSpec((tb, D), lambda i: (i, 0)),   # teacher tile
            ],
            out_specs=pl.BlockSpec((1, 8, 128), lambda i: (i, 0, 0)),
        ),
        compiler_params=pltpu.CompilerParams(
            dimension_semantics=("parallel",),
            vmem_limit_bytes=vmem_limit,
        ),
        cost_estimate=cost,
    )(student_descriptors, teacher_descriptors)

    loss = jnp.sum(out[:, 0, 0]) / jnp.float32(B)
    return loss * jnp.float32(temperature) ** 2


def _kd_loss_ref(s, t, temperature=1.0):
    """Pure-JAX reference mirroring the PyTorch module."""
    s = s / jnp.maximum(jnp.linalg.norm(s, axis=1, keepdims=True), 1e-12)
    t = t / jnp.maximum(jnp.linalg.norm(t, axis=1, keepdims=True), 1e-12)
    sl, tl = s / temperature, t / temperature
    log_ps = jax.nn.log_softmax(sl, axis=1)
    log_pt = jax.nn.log_softmax(tl, axis=1)
    pt = jnp.exp(log_pt)
    kd = jnp.sum(pt * (log_pt - log_ps)) / s.shape[0]
    return kd * temperature ** 2


if __name__ == "__main__":
    key = jax.random.PRNGKey(0)
    k1, k2 = jax.random.split(key)
    # Small but non-trivial: B not a multiple of the tile, D lane-aligned.
    B, D = 20, 128
    student = jax.random.normal(k1, (B, D), dtype=jnp.float32)
    teacher = jax.random.normal(k2, (B, D), dtype=jnp.float32)
    temperature = 2.0

    # block_rows=8 forces a multi-block grid (+ masked partial last block)
    # even at this small demo size; production default is 512.
    loss = kd_loss(student, teacher, temperature, block_rows=8)
    jax.block_until_ready(loss)

    ref = _kd_loss_ref(student, teacher, temperature)
    assert jnp.allclose(loss, ref, rtol=1e-4, atol=1e-5), (loss, ref)

    # Also exercise the default (single-block) tiling path.
    loss2 = kd_loss(student, teacher, temperature)
    jax.block_until_ready(loss2)
    assert jnp.allclose(loss2, ref, rtol=1e-4, atol=1e-5), (loss2, ref)

    print("KERNEL_OK")
</pallas_src>

<mosaic_0001>
module attributes {stable_mosaic.version = 11 : i64} {
  func.func @_kd_loss_kernel(%arg0: i32, %arg1: memref<8x128xf32, #tpu.memory_space<vmem>>, %arg2: memref<8x128xf32, #tpu.memory_space<vmem>>, %arg3: memref<1x8x128xf32, #tpu.memory_space<vmem>>) attributes {dimension_semantics = [#tpu.dimension_semantics<parallel>], iteration_bounds = array<i64: 3>, scalar_prefetch = 0 : i64, scratch_operands = 0 : i64, tpu.core_type = #tpu.core_type<tc>, window_params = [{transform_indices = @transform_0, window_bounds = array<i64: 8, 128>}, {transform_indices = @transform_1, window_bounds = array<i64: 8, 128>}, {transform_indices = @transform_2, window_bounds = array<i64: 1, 8, 128>}]} {
    %c0 = arith.constant 0 : index
    %c0_0 = arith.constant 0 : index
    %0 = vector.load %arg1[%c0, %c0_0] : memref<8x128xf32, #tpu.memory_space<vmem>>, vector<8x128xf32>
    %c0_1 = arith.constant 0 : index
    %c0_2 = arith.constant 0 : index
    %1 = vector.load %arg2[%c0_1, %c0_2] : memref<8x128xf32, #tpu.memory_space<vmem>>, vector<8x128xf32>
    %2 = arith.mulf %0, %0 : vector<8x128xf32>
    %cst = arith.constant dense<0.000000e+00> : vector<8xf32>
    %3 = vector.multi_reduction <add>, %2, %cst [1] : vector<8x128xf32> to vector<8xf32>
    %4 = vector.shape_cast %3 : vector<8xf32> to vector<8x1xf32>
    %cst_3 = arith.constant 1.000000e-24 : f32
    %5 = vector.broadcast %cst_3 : f32 to vector<8x1xf32>
    %6 = arith.maximumf %4, %5 : vector<8x1xf32>
    %7 = math.rsqrt %6 : vector<8x1xf32>
    %cst_4 = arith.constant 5.000000e-01 : f32
    %8 = vector.broadcast %cst_4 : f32 to vector<8x1xf32>
    %9 = arith.mulf %7, %8 : vector<8x1xf32>
    %10 = arith.mulf %1, %1 : vector<8x128xf32>
    %cst_5 = arith.constant dense<0.000000e+00> : vector<8xf32>
    %11 = vector.multi_reduction <add>, %10, %cst_5 [1] : vector<8x128xf32> to vector<8xf32>
    %12 = vector.shape_cast %11 : vector<8xf32> to vector<8x1xf32>
    %cst_6 = arith.constant 1.000000e-24 : f32
    %13 = vector.broadcast %cst_6 : f32 to vector<8x1xf32>
    %14 = arith.maximumf %12, %13 : vector<8x1xf32>
    %15 = math.rsqrt %14 : vector<8x1xf32>
    %cst_7 = arith.constant 5.000000e-01 : f32
    %16 = vector.broadcast %cst_7 : f32 to vector<8x1xf32>
    %17 = arith.mulf %15, %16 : vector<8x1xf32>
    %18 = vector.broadcast %9 : vector<8x1xf32> to vector<8x128xf32>
    %19 = arith.mulf %0, %18 : vector<8x128xf32>
    %20 = vector.broadcast %17 : vector<8x1xf32> to vector<8x128xf32>
    %21 = arith.mulf %1, %20 : vector<8x128xf32>
    %cst_8 = arith.constant dense<0xFF800000> : vector<8xf32>
    %22 = vector.multi_reduction <maximumf>, %19, %cst_8 [1] : vector<8x128xf32> to vector<8xf32>
    %23 = vector.shape_cast %22 : vector<8xf32> to vector<8x1xf32>
    %cst_9 = arith.constant dense<0xFF800000> : vector<8xf32>
    %24 = vector.multi_reduction <maximumf>, %21, %cst_9 [1] : vector<8x128xf32> to vector<8xf32>
    %25 = vector.shape_cast %24 : vector<8xf32> to vector<8x1xf32>
    %26 = vector.broadcast %23 : vector<8x1xf32> to vector<8x128xf32>
    %27 = arith.subf %19, %26 : vector<8x128xf32>
    %28 = math.exp %27 : vector<8x128xf32>
    %29 = vector.broadcast %25 : vector<8x1xf32> to vector<8x128xf32>
    %30 = arith.subf %21, %29 : vector<8x128xf32>
    %31 = math.exp %30 : vector<8x128xf32>
    %cst_10 = arith.constant dense<0.000000e+00> : vector<8xf32>
    %32 = vector.multi_reduction <add>, %28, %cst_10 [1] : vector<8x128xf32> to vector<8xf32>
    %33 = vector.shape_cast %32 : vector<8xf32> to vector<8x1xf32>
    %cst_11 = arith.constant dense<0.000000e+00> : vector<8xf32>
    %34 = vector.multi_reduction <add>, %31, %cst_11 [1] : vector<8x128xf32> to vector<8xf32>
    %35 = vector.shape_cast %34 : vector<8xf32> to vector<8x1xf32>
    %36 = arith.divf %35, %33 : vector<8x1xf32>
    %37 = math.log %36 : vector<8x1xf32>
    %38 = arith.subf %25, %23 : vector<8x1xf32>
    %39 = arith.addf %37, %38 : vector<8x1xf32>
    %40 = arith.subf %21, %19 : vector<8x128xf32>
    %41 = arith.mulf %31, %40 : vector<8x128xf32>
    %cst_12 = arith.constant dense<0.000000e+00> : vector<8xf32>
    %42 = vector.multi_reduction <add>, %41, %cst_12 [1] : vector<8x128xf32> to vector<8xf32>
    %43 = vector.shape_cast %42 : vector<8xf32> to vector<8x1xf32>
    %44 = arith.divf %43, %35 : vector<8x1xf32>
    %45 = arith.subf %44, %39 : vector<8x1xf32>
    %c8_i32 = arith.constant 8 : i32
    %46 = arith.muli %arg0, %c8_i32 : i32
    %47 = tpu.iota {dimensions = array<i32: 0>} : vector<8x1xi32>
    %48 = vector.broadcast %46 : i32 to vector<8x1xi32>
    %49 = arith.addi %48, %47 : vector<8x1xi32>
    %c20_i32 = arith.constant 20 : i32
    %50 = vector.broadcast %c20_i32 : i32 to vector<8x1xi32>
    %51 = arith.cmpi slt, %49, %50 : vector<8x1xi32>
    %cst_13 = arith.constant 0.000000e+00 : f32
    %52 = vector.broadcast %cst_13 : f32 to vector<8x1xf32>
    %53 = arith.select %51, %45, %52 : vector<8x1xi1>, vector<8x1xf32>
    %54 = vector.shape_cast %53 : vector<8x1xf32> to vector<1x8x1xf32>
    %cst_14 = arith.constant dense<0.000000e+00> : vector<1xf32>
    %55 = vector.multi_reduction <add>, %54, %cst_14 [1, 2] : vector<1x8x1xf32> to vector<1xf32>
    %56 = vector.shape_cast %55 : vector<1xf32> to vector<1x1x1xf32>
    %57 = vector.extract %56[0, 0, 0] : f32 from vector<1x1x1xf32>
    %58 = vector.broadcast %57 : f32 to vector<1x8x128xf32>
    %c0_15 = arith.constant 0 : index
    %c0_16 = arith.constant 0 : index
    %c0_17 = arith.constant 0 : index
    %59 = vector.load %arg3[%c0_15, %c0_16, %c0_17] : memref<1x8x128xf32, #tpu.memory_space<vmem>>, vector<1x8x128xf32>
    tpu.vector_store %arg3[%c0_15, %c0_16, %c0_17], %58 {strides = array<i32>} : memref<1x8x128xf32, #tpu.memory_space<vmem>>, vector<1x8x128xf32>,
    return
  }
  func.func @transform_0(%arg0: i32) -> (i32, i32) {
    %c0_i32 = arith.constant 0 : i32
    %c0_i32_0 = arith.constant 0 : i32
    return %arg0, %c0_i32 : i32, i32
  }
  func.func @transform_1(%arg0: i32) -> (i32, i32) {
    %c0_i32 = arith.constant 0 : i32
    %c0_i32_0 = arith.constant 0 : i32
    return %arg0, %c0_i32 : i32, i32
  }
  func.func @transform_2(%arg0: i32) -> (i32, i32, i32) {
    %c0_i32 = arith.constant 0 : i32
    %c0_i32_0 = arith.constant 0 : i32
    %c0_i32_1 = arith.constant 0 : i32
    return %arg0, %c0_i32, %c0_i32_0 : i32, i32, i32
  }
}

</mosaic_0001>

<bundles_post_ra>
// kernel: tpu_custom_call.1
= control target key start
LH: loop header
LB: loop body
LE: loop exit
PB: predicated region body
PF: predicated region fallthrough
CT: control target
= control target key end

     0   :  { %7 = vsyncpa [#allocation3], 0  ;;  %s813_s0 = inlined_call_operand.hbm [shape: f32[24,128], index: 0, kind: input, shape index: {}]   ;;  %s814_s1 = inlined_call_operand.hbm [shape: f32[24,128], index: 1, kind: input, shape index: {}]   ;;  %s815_s2 = inlined_call_operand.hbm [shape: f32[3,8,128], index: 2, kind: output, shape index: {}]  }
   0x1   :  { %9 = vsyncpa [#allocation3 + $0x1], 0 }
   0x2   :  { %10 = vsyncpa [#allocation6], 0 }
   0x3   :  { %12 = vsyncpa [#allocation6 + $0x1], 0 }
   0x4   :  { %13 = vsyncpa [#allocation4], 0 }
   0x5   :  { %15 = vsyncpa [#allocation4 + $0x1], 0  ;;  %s646_s9 = smov 0   ;;  %s648_s10 = smov 0  }
   0x6   :  { %s650_s11 = smov 0   ;;  %s652_s12 = smov 0  }
   0x7 LB: > { %s667_s13 = sadd.s32 4294967295, %s629_s12   ;;  %s416_s14 = sadd.s32 4294967294, %s629_s12   ;;  %s629_s12 = sphi %s652_s12, %s825_s12   ;;  %s625_s11 = sphi %s650_s11, %s824_s11   ;;  %s621_s10 = sphi %s648_s10, %s823_s10   ;;  %s617_s9 = sphi %s646_s9, %s822_s9  }
   0x8   : > { %s671_s15 = sadd.s32 1, %s629_s12   ;;  %s28_s16 = sadd.s32 1, %s625_s11 }
   0x9   : > { %s25_s17 = ssub.s32 %s629_s12, %s671_s15  ;;  %p35_p0 = scmp.ne.s32.totalorder %s625_s11, %s621_s10 }
   0xa   : > { %p26_p1 = scmp.eq.s32.totalorder %s25_s17, 0  ;;  %p36_p2 = scmp.eq.s32.totalorder %s629_s12, 0 }
   0xb   : > { %p41_p3 = scmp.ne.s32.totalorder %s621_s10, %s617_s9  ;;  %p42_p4 = scmp.eq.s32.totalorder %s667_s13, 0 }
   0xc   : > { %s683_s18 = scalar_select %p26_p1, %s625_s11, %s28_s16  }
   0xd   : > { %p685_p5 = por %p36_p2, %p35_p0  ;;  %p689_p6 = por %p42_p4, %p41_p3 }
   0xe   : > { %p91_p7 = scmp.eq.s32.totalorder %s667_s13, 2  ;;  %p97_p8 = scmp.eq.s32.totalorder %s416_s14, 2 }
   0xf   : > { %p451_p9 = scmp.lt.s32.totalorder %s629_s12, 3  ;;  %s704_s23 = sand.u32 1, %s625_s11  }
  0x10   : > { %p695_p10 = por %p91_p7, %p35_p0  ;;  %p699_p11 = por %p97_p8, %p41_p3 }
  0x11   : > { %s420_s24 = sshll.u32 %s629_s12, 3  ;;  %s419_s25 = sshll.u32 %s704_s23, 3 }
  0x12   : > { %s125_s28 = scalar_lea.hbm %s813_s0, %s420_s24  ;;  %s121_s30 = scalar_lea.vmem [#allocation2], %s419_s25 }
  0x13   : > { %s127_s29 = sshll.u32 %s125_s28, 4  ;;  %s129_s3 = sshll.u32 %s121_s30, 4  ;;  %s128_s29 = int_to_ptr.hbm [resolvable:$true] %s127_s29  ;;  %s130_s3 = int_to_ptr.vmem [resolvable:$true] %s129_s3 }
  0x14   : > { %p713_p12 = pnand %p451_p9, %p685_p5  ;;  %p423_p13 = scmp.ge.s32.totalorder %s629_s12, 1 }
  0x15   : > { %p153_p0 = scmp.lt.s32.totalorder %s629_s12, 4  ;;  %s118_s5 = scalar_lea.sflag [#allocation3], %s704_s23 }
  0x16   : > { %s499_s6 = sshra.s32 %s128_s29, 4  ;;  %p503_p2 = pneg %p713_p12  ;;  %s500_s6 = int_to_ptr.hbm [resolvable:$true] %s499_s6 }
  0x17   : > { %s501_s7 = scalar_lea.hbm %s500_s6, 8  ;;  %s506_s16 = scalar_lea.hbm %s813_s0, 24 }
  0x18   : > { %p502_p1 = scmp.ne.s32.totalorder %s500_s6, %s501_s7  ;;  %p507_p5 = scmp.lt.s32.totalorder %s500_s6, %s813_s0 }
  0x19   : > { %p508_p7 = scmp.lt.s32.totalorder %s506_s16, %s501_s7 }
  0x1a   : > { %p504_p3 = pnand %p503_p2, %p502_p1 }
  0x1b   : > { %p509_p8 = por %p508_p7, %p507_p5 }
  0x1c   : > { %p505_p4 = pneg %p504_p3 }
  0x1e   : > { %p510_p9 = pnand %p509_p8, %p505_p4 }
  0x20   : > { %513 = shalt.err (!%p510_p9)
}
  0x21   : > { %443 = dma.hbm_to_vmem [thread:$0]  (!%p713_p12), %s128_s29, 128, %s130_s3, %s118_s5  }
  0x22   : > { %p737_p1 = pnand %p423_p13, %p153_p0  ;;  %s144_s30 = scalar_lea.hbm %s814_s1, %s420_s24 }
  0x23   : > { %s146_s6 = sshll.u32 %s144_s30, 4  ;;  %s140_s7 = scalar_lea.vmem [#allocation5], %s419_s25  ;;  %s147_s6 = int_to_ptr.hbm [resolvable:$true] %s146_s6 }
  0x24   : > { %s148_s8 = sshll.u32 %s140_s7, 4  ;;  %s137_s14 = scalar_lea.sflag [#allocation6], %s704_s23  ;;  %s149_s8 = int_to_ptr.vmem [resolvable:$true] %s148_s8 }
  0x25   : > { %s529_s16 = sshra.s32 %s147_s6, 4  ;;  %s536_s5 = scalar_lea.hbm %s814_s1, 24  ;;  %s530_s16 = int_to_ptr.hbm [resolvable:$true] %s529_s16 }
  0x26   : > { %s531_s17 = scalar_lea.hbm %s530_s16, 8  ;;  %p537_p4 = scmp.lt.s32.totalorder %s530_s16, %s814_s1 }
  0x27   : > { %p532_p3 = scmp.ne.s32.totalorder %s530_s16, %s531_s17  ;;  %p538_p5 = scmp.lt.s32.totalorder %s536_s5, %s531_s17 }
  0x29   : > { %p534_p13 = pnand %p532_p3, %p503_p2  ;;  %p539_p7 = por %p538_p5, %p537_p4 }
  0x2b   : > { %p535_p0 = pneg %p534_p13 }
  0x2d   : > { %p540_p8 = pnand %p539_p7, %p535_p0 }
  0x2f   : > { %543 = shalt.err (!%p540_p8)
}
  0x30   : > { %446 = dma.hbm_to_vmem [thread:$0]  (!%p713_p12), %s147_s6, 128, %s149_s8, %s137_s14  }
  0x31   : > { %157 = sbr.rel (%p737_p1) target bundleno = 659 (0x293), region = 28  ;;  %s759_s23 = sand.u32 (!%p737_p1), 1, %s621_s10  }
  0x32   : > { %s762_s25 = sshll.u32 (!%p737_p1), %s759_s23, 3  ;;  %s160_s27 = scalar_lea.sflag (!%p737_p1), [#allocation3], %s759_s23 }
  0x33   : > { %s163_s28 = scalar_lea.vmem (!%p737_p1), [#allocation2], %s762_s25 }
  0x36   : > { %604 = dma.done.wait (%p689_p6), %s160_s27, 128  }
  0x37   : > { %606 = vsyncadd (%p689_p6), %s160_s27, 4294967168  ;;  %s170_s4 = scalar_lea.sflag [#allocation6], %s759_s23  ;;  %s173_s26 = scalar_lea.vmem [#allocation5], %s762_s25 }
  0x38   : > { %608 = dma.done.wait (%p689_p6), %s170_s4, 128  }
  0x39   : > { %610 = vsyncadd (%p689_p6), %s170_s4, 4294967168  ;;  %v200_v0 = vld [vmem:[%s163_s28] sm:$0xff]  ;;  %v201_v2 = vld [vmem:[%s173_s26] sm:$0xff]  ;;  %v288_v52 = vlaneseq  ;;  %s427_s20 = sshll.u32 %s667_s13, 3  ;;  %vm294_vm15 = vcmask 7168   ;;  %s199_s8 = scalar_lea.vmem [#allocation7], %s762_s25 }
  0x3a   : > { %v202_v1 = vmul.f32 %v200_v0, %v200_v0  ;;  %v217_v3 = vmul.f32 %v201_v2, %v201_v2  ;;  %v290_v58 = vstv %s427_s20  ;;  %s318_s7 = scalar_lea.hbm %s815_s2, %s427_s20  ;;  %s320_s14 = sshll.u32 %s199_s8, 4  ;;  %s321_s14 = int_to_ptr.vmem [resolvable:$true] %s320_s14 }
  0x3b   : > { %v289_v57 = vshrl.u32 %v288_v52, 7  ;;  %s322_s16 = sshll.u32 %s318_s7, 4  ;;  %s308_s29 = scalar_lea.sflag [#allocation4], %s759_s23  ;;  %s323_s16 = int_to_ptr.hbm [resolvable:$true] %s322_s16 }
  0x3c   : > { %203 = vadd.xlane.f32.xlu0 %v202_v1  ;;  %s573_s3 = sshra.s32 %s323_s16, 4  ;;  %s579_s24 = scalar_lea.hbm %s815_s2, 24  ;;  %s574_s3 = int_to_ptr.hbm [resolvable:$true] %s573_s3 }
  0x3d   : > { %v291_v63 = vadd.s32 %v290_v58, %v289_v57  ;;  %s575_s5 = scalar_lea.hbm %s574_s3, 8  ;;  %p580_p9 = scmp.lt.s32.totalorder %s574_s3, %s815_s2 }
  0x3e   : > { %p576_p6 = scmp.ne.s32.totalorder %s574_s3, %s575_s5  ;;  %p581_p1 = scmp.lt.s32.totalorder %s579_s24, %s575_s5 }
  0x3f   : > { %vm292_vm14 = vcmp.lt.s32.totalorder %v291_v63, 20 }
  0x40   : > { %p577_p12 = pnand %p576_p6, %p695_p10  ;;  %p582_p3 = por %p581_p1, %p580_p9 }
  0x42   : > { %p578_p2 = pneg %p577_p12 }
  0x44   : > { %218 = vadd.xlane.f32.xlu0 %v217_v3  ;;  %p583_p13 = pnand %p582_p3, %p578_p2 }
  0xaf   : > { %v204_v4 = vpop.xlane.xlu0 %203 }
  0xb0   : > { %v205_v5 = vmax.f32 %v204_v4, 1e-24 }
  0xb2   : > { %485 = vrsqrt.f32 %v205_v5  ;;  %vm212_vm1 = vweird.f32 %v205_v5 }
  0xb7   : > { %v219_v6 = vpop.xlane.xlu0 %218 }
  0xb8   : > { %v486_v7 = vpop.eup %485  ;;  %v220_v8 = vmax.f32 %v219_v6, 1e-24 }
  0xb9   : > { %v207_v9 = vmul.f32 %v486_v7, %v205_v5  ;;  %vm213_vm0 = vweird.f32 %v486_v7 }
  0xba   : > { %487 = vrsqrt.f32 %v220_v8  ;;  %vm214_vm2 = vmor %vm212_vm1, %vm213_vm0  ;;  %vm227_vm4 = vweird.f32 %v220_v8 }
  0xbb   : > { %v208_v10 = vmul.f32 %v486_v7, %v207_v9 }
  0xbd   : > { %v209_v11 = vmul.f32 0.5, %v208_v10 }
  0xbf   : > { %v210_v12 = vsub.f32 1.5, %v209_v11 }
  0xc0   : > { %v488_v13 = vpop.eup %487 }
  0xc1   : > { %v211_v14 = vmul.f32 %v486_v7, %v210_v12  ;;  %v222_v15 = vmul.f32 %v488_v13, %v220_v8  ;;  %vm228_vm3 = vweird.f32 %v488_v13 }
  0xc2   : > { %vm229_vm5 = vmor %vm227_vm4, %vm228_vm3 }
  0xc3   : > { %v223_v16 = vmul.f32 %v488_v13, %v222_v15  ;;  %v215_v17 = vsel %vm214_vm2, %v486_v7, %v211_v14 }
  0xc4   : > { %v216_v18 = vmul.f32 0.5, %v215_v17 }
  0xc5   : > { %v224_v19 = vmul.f32 0.5, %v223_v16 }
  0xc6   : > { %v232_v20 = vmul.f32 %v216_v18, %v200_v0 }
  0xc7   : > { %v225_v21 = vsub.f32 1.5, %v224_v19 }
  0xc8   : > { %234 = vmax.xlane.f32.xlu1 %v232_v20 }
  0xc9   : > { %v226_v22 = vmul.f32 %v488_v13, %v225_v21 }
  0xcb   : > { %v230_v23 = vsel %vm229_vm5, %v488_v13, %v226_v22 }
  0xcc   : > { %v231_v24 = vmul.f32 0.5, %v230_v23 }
  0xce   : > { %v233_v25 = vmul.f32 %v231_v24, %v201_v2 }
  0xd0   : > { %236 = vmax.xlane.f32.xlu1 %v233_v25  ;;  %v267_v33 = vsub.f32 %v233_v25, %v232_v20 }
 0x13b   : > { %v235_v26 = vpop.xlane.xlu1 %234 }
 0x13c   : > { %v238_v27 = vsub.f32 %v232_v20, %v235_v26 }
 0x13e   : > { %v239_v28 = vmul.f32 1.442695, %v238_v27 }
 0x140   : > { %489 = vpow2.f32 %v239_v28 }
 0x143   : > { %v237_v29 = vpop.xlane.xlu1 %236 }
 0x144   : > { %v241_v30 = vsub.f32 %v233_v25, %v237_v29  ;;  %v265_v0 = vsub.f32 %v237_v29, %v235_v26 }
 0x146   : > { %v490_v31 = vpop.eup %489  ;;  %v242_v32 = vmul.f32 1.442695, %v241_v30 }
 0x147   : > { %244 = vadd.xlane.f32.xlu2 %v490_v31 }
 0x148   : > { %491 = vpow2.f32 %v242_v32 }
 0x14e   : > { %v492_v34 = vpop.eup %491 }
 0x14f   : > { %246 = vadd.xlane.f32.xlu2 %v492_v34  ;;  %v268_v35 = vmul.f32 %v492_v34, %v267_v33 }
 0x151   : > { %269 = vadd.xlane.f32.xlu0 %v268_v35 }
 0x1ba   : > { %v245_v36 = vpop.xlane.xlu2 %244 }
 0x1bb   : > { %493 = vrcp.f32 %v245_v36  ;;  %v259_v41 = vand.u32 2147483648, %v245_v36  ;;  %v257_v43 = vand.u32 2147483647, %v245_v36  ;;  %vm253_vm7 = vweird.f32 %v245_v36 }
 0x1bd   : > { %v260_v46 = vor.u32 1.1754944e-38, %v259_v41  ;;  %vm258_vm9 = vcmp.eq.f32.partialorder %v257_v43, 8.507059e+37 }
 0x1c1   : > { %v494_v37 = vpop.eup %493 }
 0x1c2   : > { %v249_v38 = vmul.f32 %v494_v37, %v245_v36  ;;  %v247_v39 = vpop.xlane.xlu2 %246  ;;  %vm254_vm6 = vweird.f32 %v494_v37 }
 0x1c3   : > { %495 = vrcp.f32 %v247_v39  ;;  %vm255_vm8 = vmor %vm253_vm7, %vm254_vm6  ;;  %v282_v54 = vand.u32 2147483648, %v247_v39  ;;  %v280_v55 = vand.u32 2147483647, %v247_v39  ;;  %vm276_vm11 = vweird.f32 %v247_v39 }
 0x1c4   : > { %v250_v40 = vsub.f32 1.0, %v249_v38  ;;  %v270_v2 = vpop.xlane.xlu0 %269 }
 0x1c5   : > { %v283_v60 = vor.u32 1.1754944e-38, %v282_v54  ;;  %vm281_vm13 = vcmp.eq.f32.partialorder %v280_v55, 8.507059e+37 }
 0x1c6   : > { %v251_v42 = vmul.f32 %v494_v37, %v250_v40 }
 0x1c8   : > { %v252_v44 = vadd.f32 %v494_v37, %v251_v42 }
 0x1c9   : > { %v496_v45 = vpop.eup %495 }
 0x1ca   : > { %v256_v47 = vsel %vm255_vm8, %v494_v37, %v252_v44  ;;  %v272_v48 = vmul.f32 %v496_v45, %v247_v39  ;;  %vm277_vm10 = vweird.f32 %v496_v45 }
 0x1cb   : > { %v261_v49 = vsel %vm258_vm9, %v260_v46, %v256_v47  ;;  %vm278_vm12 = vmor %vm276_vm11, %vm277_vm10 }
 0x1cc   : > { %v262_v50 = vmul.f32 %v261_v49, %v247_v39  ;;  %v273_v51 = vsub.f32 1.0, %v272_v48 }
 0x1ce   : > { %497 = vlog2.f32 %v262_v50  ;;  %v274_v53 = vmul.f32 %v496_v45, %v273_v51 }
 0x1d0   : > { %v275_v56 = vadd.f32 %v496_v45, %v274_v53 }
 0x1d2   : > { %v279_v59 = vsel %vm278_vm12, %v496_v45, %v275_v56 }
 0x1d3   : > { %v284_v62 = vsel %vm281_vm13, %v283_v60, %v279_v59 }
 0x1d4   : > { %v498_v61 = vpop.eup %497  ;;  %v285_v4 = vmul.f32 %v284_v62, %v270_v2 }
 0x1d5   : > { %v264_v1 = vmul.f32 0.6931472, %v498_v61 }
 0x1d7   : > { %v266_v3 = vadd.f32 %v265_v0, %v264_v1 }
 0x1d9   : > { %v286_v5 = vsub.f32 %v285_v4, %v266_v3 }
 0x1db   : > { %v293_v6 = vsel %vm292_vm14, %v286_v5, 0.0 }
 0x1dc   : > { %v295_v7 = vsel %vm294_vm15, %v293_v6, 0.0 }
 0x1dd   : > { %296 = vadd.xlane.f32.xlu1 %v295_v7 }
 0x250   : > { %v297_v8 = vpop.xlane.xlu1 %296 }
 0x251   : > { %v298_v9 = vrot.slane %v297_v8, 4 }
 0x253   : > { %v299_v10 = vadd.f32 %v298_v9, %v297_v8 }
 0x255   : > { %v300_v11 = vrot.slane %v299_v10, 2 }
 0x257   : > { %v301_v12 = vadd.f32 %v300_v11, %v299_v10 }
 0x259   : > { %v302_v13 = vrot.slane %v301_v12, 1 }
 0x25b   : > { %v303_v14 = vadd.f32 %v302_v13, %v301_v12 }
 0x25d   : > { %432 = vpush %v303_v14 }
 0x28e   : > { %s433_s17 = spop %432 }
 0x28f   : > { %v305_v15 = vstv %s433_s17 }
 0x290   : > { %306 = vst [vmem:[%s199_s8] sm:$0xff] %v305_v15 }
 0x291   : > { %586 = shalt.err (!%p583_p13)
}
 0x292   : > { %438 = dma.vmem_to_hbm [thread:$0]  (%p695_p10), %s321_s14, 128, %s323_s16, %s308_s29  }
 0x293 PF: > { %p452_p0 = scmp.ge.s32.totalorder %s629_s12, 2  ;;  %s334_s23 = sand.u32 1, %s617_s9  }
 0x294   : > { %s335_s28 = scalar_lea.sflag [#allocation4], %s334_s23 }
 0x295   : > { %p448_p4 = pnand %p452_p0, %p699_p11 }
 0x297   : > { %p449_p5 = pneg %p448_p4 }
 0x299   : > { %612 = dma.done.wait (%p449_p5), %s335_s28, 128  }
 0x29a   : > { %614 = vsyncadd (%p449_p5), %s335_s28, 4294967168  ;;  %p18_p7 = scmp.ge.s32.totalorder %s671_s15, 5   ;;  %s822_s9 = smov %s621_s10 }
 0x29b   : > { %s823_s10 = smov %s625_s11  ;;  %s824_s11 = smov %s683_s18 }
 0x29c   : > { %s825_s12 = smov %s671_s15  ;;  %20 = sbr.rel (!%p18_p7) target bundleno = 7 (0x7), region = 86 }
 0x2a1   :  { %341 = vsyncpa [#allocation3], 1 }
 0x2a2   :  { %343 = vsyncpa [#allocation3 + $0x1], 1 }
 0x2a3   :  { %344 = vsyncpa [#allocation6], 1 }
 0x2a4   :  { %346 = vsyncpa [#allocation6 + $0x1], 1 }
 0x2a5   :  { %347 = vsyncpa [#allocation4], 1 }
 0x2a6   :  { %349 = vsyncpa [#allocation4 + $0x1], 1 }

</bundles_post_ra>
